<compile_context>
chip_gen: v7x
topology: tpu7x:2x2x1
jax: 0.10.0
libtpu: 0.0.40
codegen_flags: <defaults>
</compile_context>

<pallas_src>
import math
from functools import partial
from typing import NamedTuple

import jax
import jax.numpy as jnp
from jax.experimental import pallas as pl
from jax.experimental.pallas import tpu as pltpu


# ---------------------------------------------------------------------------
# Static planning helpers
# ---------------------------------------------------------------------------

def _round_up(x, m):
    return (x + m - 1) // m * m


def _vmem_capacity_bytes():
    try:
        info = pltpu.get_tpu_info()
        for name in ("vmem_capacity_bytes", "vmem_bytes", "vmem_size_bytes"):
            v = getattr(info, name, None)
            if v:
                return int(v)
    except Exception:
        pass
    return 64 * 1024 * 1024          # v7x floor -> safe on every generation


def _max_abs_sin_deg(deg_lo, deg_hi):
    """max |sin(theta)| over theta (degrees) in [deg_lo, deg_hi]."""
    if deg_hi - deg_lo >= 180:
        return 1.0
    k = math.ceil((deg_lo - 90) / 180.0)
    if 90 + 180 * k <= deg_hi:       # an odd multiple of 90 deg inside range
        return 1.0
    return max(abs(math.sin(math.radians(deg_lo))),
               abs(math.sin(math.radians(deg_hi))))


class _Plan(NamedTuple):
    TN: int          # destination-column tile (lane dim of output)
    TM: int          # row-plane tile
    Mp: int          # padded plane count
    HWp: int         # padded flattened spatial size
    K_win: int       # source band-window granularity (banded mode)
    KS: int          # rows of the one-hot select slab S
    banded: bool
    n_tiles: int
    m_tiles: int
    vmem_limit: int


def _candidate(M, HW, H, W, sin_max, TN, budget):
    HWp0 = _round_up(HW, TN)
    # Worst-case spread of source flat indices inside one TN-wide dest tile
    # (static bound from the static degree range => coverage is guaranteed).
    rows_span = TN // W + 1
    a = sin_max * (W - 1) + rows_span
    span = (int(math.ceil(a)) + 1) * W + (W - 1)
    K_win = _round_up(span, TN)

    if 3 * K_win <= HWp0:
        banded = True
        HWp = _round_up(HWp0, K_win)     # multiple of K_win and of TN
        KS = 2 * K_win                   # two adjacent windows cover any band
    else:
        banded = False
        HWp = HWp0
        K_win = HWp0
        KS = HWp0

    m8 = _round_up(max(M, 1), 8)
    ladder = [m8] + [t for t in (128, 64, 32, 16, 8) if t < m8]
    TM, est = m8, None
    for tm in ladder:
        s_b = KS * TN * 2                                  # bf16 S slab
        src_b = 2 * TN * 4                                 # src-index blocks
        img_b = (2 * 2 * tm * K_win * 4) if banded else (2 * tm * HWp * 4)
        out_b = 2 * tm * TN * 4
        TM, est = tm, s_b + src_b + img_b + out_b
        if est <= budget:
            break
    Mp = _round_up(m8, TM)
    plan = _Plan(TN, TM, Mp, HWp, K_win, KS, banded,
                 HWp // TN, Mp // TM, 0)
    return plan, est


def _vmem_limit(est, cap):
    return int(min(max(est * 1.5 + (4 << 20), 32 << 20), cap * 0.92))


def _make_plan(M, HW, H, W, sin_max):
    cap = _vmem_capacity_bytes()
    budget = int(cap * 0.70)
    fallback = None
    for TN in (512, 256, 128):               # biggest lane-dense tile first
        if TN > _round_up(HW, 128):
            continue
        plan, est = _candidate(M, HW, H, W, sin_max, TN, budget)
        if est <= budget:
            return plan._replace(vmem_limit=_vmem_limit(est, cap))
        if fallback is None or est < fallback[1]:
            fallback = (plan, est)
    plan, est = fallback
    if est > int(cap * 0.92):
        raise ValueError(
            f"RandomRotation Pallas kernel: H*W={HW} with this degree range "
            f"needs ~{est / 2**20:.0f} MiB VMEM (> {cap / 2**20:.0f} MiB). "
            "The one-hot-matmul formulation does not scale to this size; a "
            "gather-based kernel is required (see TODO in the header).")
    return plan._replace(vmem_limit=_vmem_limit(est, cap))


# ---------------------------------------------------------------------------
# Shared index math (single source of truth for wrapper, kernel and reference)
# ---------------------------------------------------------------------------

def _pil_rotation_matrix(angle_deg, w, h):
    """Inverse affine exactly as PIL Image.rotate(angle, expand=0) builds it."""
    ang = -(angle_deg % 360.0) * (math.pi / 180.0)
    cos = jnp.cos(ang)
    sin = jnp.sin(ang)
    a, b, d, e = cos, sin, -sin, cos
    cx, cy = w / 2.0, h / 2.0
    c = a * (-cx) + b * (-cy) + cx
    f = d * (-cx) + e * (-cy) + cy
    return jnp.stack([a, b, c, d, e, f]).astype(jnp.float32)


def _source_index(matrix, H, W, HWp):
    """Nearest-neighbour source flat index per destination pixel; -1 == fill.

    NOTE: floor() vs PIL's toward-zero truncation only differs for source
    coordinates in (-1, 0); both paths end up at fill=0 after the bounds
    check, so the one-pixel border nuance only matters for exact PIL parity.
    """
    t = jnp.arange(HWp, dtype=jnp.int32)
    y_out = t // W
    x_out = t - y_out * W
    xo = x_out.astype(jnp.float32) + 0.5
    yo = y_out.astype(jnp.float32) + 0.5
    a, b, c, d, e, f = (matrix[i] for i in range(6))
    xin = a * xo + b * yo + c
    yin = d * xo + e * yo + f
    src_x = jnp.floor(xin).astype(jnp.int32)
    src_y = jnp.floor(yin).astype(jnp.int32)
    valid = ((src_x >= 0) & (src_x < W) & (src_y >= 0) & (src_y < H)
             & (t < H * W))
    return jnp.where(valid, src_y * W + src_x, -1)


def _rotate_reference(flat, matrix, H, W):
    """Pure-JAX reference (XLA gather) of the same rotation semantics."""
    HW = H * W
    src = _source_index(matrix, H, W, HW)
    gathered = jnp.take(flat, jnp.clip(src, 0, HW - 1), axis=1)
    return jnp.where(src[None, :] >= 0, gathered, 0.0)


# ---------------------------------------------------------------------------
# Pallas kernel
# ---------------------------------------------------------------------------

def _make_kernel(banded, K_win, KS, TN, exact_fp32):
    def kernel(q_ref, src_ref, *refs):
        # q_ref   : SMEM (n_tiles,) int32   -- per-column-tile band block index
        # src_ref : VMEM (1, TN)    int32   -- source flat index, -1 == fill
        # img*    : VMEM (TM, K_win|HWp) f32
        # out_ref : VMEM (TM, TN)   f32
        # s_ref   : VMEM (KS, TN)   bf16 scratch (one-hot select slab)
        if banded:
            img0_ref, img1_ref, out_ref, s_ref = refs
        else:
            img0_ref, out_ref, s_ref = refs
        n = pl.program_id(0)

        # Build S once per destination-column tile; row-plane tiles reuse it.
        @pl.when(pl.program_id(1) == 0)
        def _build_s():
            rel = src_ref[...]                        # (1, TN) int32
            if banded:
                rel = rel - q_ref[n] * K_win          # window-relative index
            row = jax.lax.broadcasted_iota(jnp.int32, (KS, TN), 0)
            # Fill pixels have rel < 0 and never match -> column stays zero.
            s_ref[...] = (row == rel).astype(s_ref.dtype)

        def onehot_dot(img, s_part):
            if exact_fp32:
                hi = img.astype(jnp.bfloat16)
                lo = (img - hi.astype(jnp.float32)).astype(jnp.bfloat16)
                return (jnp.dot(hi, s_part, preferred_element_type=jnp.float32)
                        + jnp.dot(lo, s_part, preferred_element_type=jnp.float32))
            return jnp.dot(img.astype(jnp.bfloat16), s_part,
                           preferred_element_type=jnp.float32)

        if banded:
            acc = onehot_dot(img0_ref[...], s_ref[:K_win, :])
            acc = acc + onehot_dot(img1_ref[...], s_ref[K_win:, :])
        else:
            acc = onehot_dot(img0_ref[...], s_ref[...])
        out_ref[...] = acc

    return kernel


def _rotate_planes_flat(flat, matrix, H, W, sin_max, exact_fp32):
    """Rotate a fused (M, H*W) f32 matrix of channel planes with one kernel."""
    M, HW = flat.shape
    p = _make_plan(M, HW, H, W, sin_max)

    padded = jnp.pad(flat, ((0, p.Mp - M), (0, p.HWp - HW)))
    src = _source_index(matrix, H, W, p.HWp)

    if p.banded:
        # Per-column-tile band table (traced jnp -> no host round trip).
        nkb = p.HWp // p.K_win
        lo = jnp.where(src >= 0, src, p.HWp).reshape(p.n_tiles, p.TN).min(axis=1)
        q = jnp.clip(lo // p.K_win, 0, nkb - 2).astype(jnp.int32)
        img_specs = [
            pl.BlockSpec((p.TM, p.K_win), lambda n, m, qr: (m, qr[n])),
            pl.BlockSpec((p.TM, p.K_win), lambda n, m, qr: (m, qr[n] + 1)),
        ]
        img_args = (padded, padded)
    else:
        q = jnp.zeros((p.n_tiles,), jnp.int32)
        # Constant block index: the fused image is DMA'd into VMEM once and
        # stays resident for every destination-column tile (no HBM re-reads
        # whenever TM == Mp, which is the common case).
        img_specs = [pl.BlockSpec((p.TM, p.HWp), lambda n, m, qr: (m, 0))]
        img_args = (padded,)

    out = pl.pallas_call(
        _make_kernel(p.banded, p.K_win, p.KS, p.TN, exact_fp32),
        out_shape=jax.ShapeDtypeStruct((p.Mp, p.HWp), jnp.float32),
        grid_spec=pltpu.PrefetchScalarGridSpec(
            num_scalar_prefetch=1,
            grid=(p.n_tiles, p.m_tiles),
            in_specs=[pl.BlockSpec((1, p.TN), lambda n, m, qr: (0, n))]
                     + img_specs,
            out_specs=pl.BlockSpec((p.TM, p.TN), lambda n, m, qr: (m, n)),
            scratch_shapes=[pltpu.VMEM((p.KS, p.TN), jnp.bfloat16)],
        ),
        compiler_params=pltpu.CompilerParams(
            dimension_semantics=("parallel", "arbitrary"),
            vmem_limit_bytes=p.vmem_limit,
        ),
    )(q, src.reshape(1, p.HWp), *img_args)
    return out[:M, :HW]


# ---------------------------------------------------------------------------
# Random-rotation wrapper (no host round-trips, true no-op branch)
# ---------------------------------------------------------------------------

@partial(jax.jit,
         static_argnames=("p", "deg_lo", "deg_hi", "H", "W", "exact_fp32"))
def _random_rotation_apply(key, flat, *, p, deg_lo, deg_hi, H, W, exact_fp32):
    k1, k2 = jax.random.split(key)
    do_rot = jax.random.uniform(k1, ()) < p
    angle = jax.random.randint(k2, (), deg_lo, deg_hi + 1).astype(jnp.float32)
    matrix = _pil_rotation_matrix(angle, float(W), float(H))
    sin_max = _max_abs_sin_deg(deg_lo, deg_hi)
    # False branch returns inputs untouched (kernel is skipped entirely).
    return jax.lax.cond(
        do_rot,
        lambda f, m: _rotate_planes_flat(f, m, H, W, sin_max, exact_fp32),
        lambda f, m: f,
        flat, matrix)


class RandomRotation:
    """JAX/Pallas port of the PyTorch RandomRotation transform.

    Like the original module, ONE integer angle is drawn per call and shared by
    every tensor.  `mxu_exact_fp32=False` uses a single bf16 one-hot matmul
    (bit-exact for uint8-valued images and 0/1 masks); `True` adds a hi/lo bf16
    split (~2^-17 relative error for arbitrary float32 inputs).
    """

    def __init__(self, degrees, p=0.5, mxu_exact_fp32=False):
        self.degrees = (int(degrees[0]), int(degrees[1]))
        self.p = float(p)
        self.mxu_exact_fp32 = bool(mxu_exact_fp32)

    def __call__(self, key, pv_imgs, art_imgs, pv_mask=None, art_mask=None):
        tensors = [pv_imgs, art_imgs]
        if pv_mask is not None:
            tensors.append(pv_mask)
        if art_mask is not None:
            tensors.append(art_mask)

        H, W = int(pv_imgs.shape[-2]), int(pv_imgs.shape[-1])
        HW = H * W
        metas = [(t.shape, t.dtype) for t in tensors]
        # Fuse all channel planes into one matrix -> single kernel invocation.
        fused = jnp.concatenate(
            [t.reshape(-1, HW).astype(jnp.float32) for t in tensors], axis=0)

        out_flat = _random_rotation_apply(
            key, fused, p=self.p,
            deg_lo=self.degrees[0], deg_hi=self.degrees[1], H=H, W=W,
            exact_fp32=self.mxu_exact_fp32)

        outs, off = [], 0
        for shape, dtype in metas:
            rows = 1
            for s in shape[:-2]:
                rows *= int(s)
            outs.append(out_flat[off:off + rows].reshape(shape).astype(dtype))
            off += rows

        it = iter(outs)
        pv_o = next(it)
        art_o = next(it)
        pv_m_o = next(it) if pv_mask is not None else None
        art_m_o = next(it) if art_mask is not None else None
        return pv_o, art_o, pv_m_o, art_m_o


# ---------------------------------------------------------------------------
# Demo / smoke test
# ---------------------------------------------------------------------------

def _reference_call(key, degrees, tensors, H, W):
    """Pure-JAX reference of the forced (p>=1) rotation path (same RNG use)."""
    _, k2 = jax.random.split(key)
    angle = jax.random.randint(
        k2, (), degrees[0], degrees[1] + 1).astype(jnp.float32)
    matrix = _pil_rotation_matrix(angle, float(W), float(H))
    outs = []
    for t in tensors:
        flat = t.reshape(-1, H * W).astype(jnp.float32)
        outs.append(_rotate_reference(flat, matrix, H, W)
                    .reshape(t.shape).astype(t.dtype))
    return outs


if __name__ == "__main__":
    root = jax.random.PRNGKey(0)
    k_data, k_aug, k_aug2 = jax.random.split(root, 3)
    ka, kb, kc, kd = jax.random.split(k_data, 4)

    # ------- small shapes -> "full" (resident image) path -------------------
    B, C, H, W = 2, 4, 16, 16
    # Integer-valued float images (like uint8 pixels) -> bf16 path is exact.
    pv_imgs = jnp.floor(jax.random.uniform(ka, (B, C, H, W)) * 255.0)
    art_imgs = jnp.floor(jax.random.uniform(kb, (B, C, H, W)) * 255.0)
    pv_mask = (jax.random.uniform(kc, (B, 1, H, W)) > 0.5).astype(jnp.float32)
    art_mask = (jax.random.uniform(kd, (B, 1, H, W)) > 0.5).astype(jnp.float32)

    # 1) Stochastic path (p=0.5): exercises both lax.cond branches.
    out = RandomRotation((-30, 30), p=0.5)(
        k_aug, pv_imgs, art_imgs, pv_mask, art_mask)
    out = jax.block_until_ready(out)
    assert out[0].shape == (B, C, H, W) and out[1].shape == (B, C, H, W)
    assert out[2].shape == (B, 1, H, W) and out[3].shape == (B, 1, H, W)

    # 2) Forced rotation vs. pure-JAX gather reference (exact for int pixels).
    aug = RandomRotation((-30, 30), p=1.0)
    got = jax.block_until_ready(
        aug(k_aug, pv_imgs, art_imgs, pv_mask, art_mask))
    ref = _reference_call(k_aug, (-30, 30),
                          [pv_imgs, art_imgs, pv_mask, art_mask], H, W)
    for g, r in zip(got, ref):
        assert jnp.allclose(g, r, atol=1e-5), "full-band path mismatch"

    # 3) 0-degree rotation == identity.
    out_id = jax.block_until_ready(
        RandomRotation((0, 0), p=1.0)(k_aug, pv_imgs, art_imgs,
                                      pv_mask, art_mask))
    assert jnp.allclose(out_id[0], pv_imgs, atol=1e-5)
    assert jnp.allclose(out_id[1], art_imgs, atol=1e-5)
    assert jnp.array_equal(out_id[2], pv_mask)
    assert jnp.array_equal(out_id[3], art_mask)

    # 4) Optional hi/lo exact-fp32 path on fractional float images.
    fr_pv = jax.random.uniform(ka, (B, C, H, W), jnp.float32)
    fr_art = jax.random.uniform(kb, (B, C, H, W), jnp.float32)
    aug_ex = RandomRotation((-30, 30), p=1.0, mxu_exact_fp32=True)
    got_ex = jax.block_until_ready(
        aug_ex(k_aug, fr_pv, fr_art, pv_mask, art_mask))
    ref_ex = _reference_call(k_aug, (-30, 30),
                             [fr_pv, fr_art, pv_mask, art_mask], H, W)
    for g, r in zip(got_ex, ref_ex):
        assert jnp.allclose(g, r, atol=1e-4), "exact-fp32 path mismatch"

    # 5) Larger image + small angle range -> banded source-window path.
    H2 = W2 = 96
    ke, kf, kg, kh = jax.random.split(jax.random.fold_in(k_data, 1), 4)
    pv2 = jnp.floor(jax.random.uniform(ke, (2, 3, H2, W2)) * 255.0)
    art2 = jnp.floor(jax.random.uniform(kf, (2, 3, H2, W2)) * 255.0)
    pvm2 = (jax.random.uniform(kg, (2, 1, H2, W2)) > 0.5).astype(jnp.float32)
    artm2 = (jax.random.uniform(kh, (2, 1, H2, W2)) > 0.5).astype(jnp.float32)
    M2 = 2 * 3 + 2 * 3 + 2 * 1 + 2 * 1
    plan2 = _make_plan(M2, H2 * W2, H2, W2, _max_abs_sin_deg(-10, 10))
    assert plan2.banded, "expected the banded source-window path here"
    aug2 = RandomRotation((-10, 10), p=1.0)
    got2 = jax.block_until_ready(aug2(k_aug2, pv2, art2, pvm2, artm2))
    ref2 = _reference_call(k_aug2, (-10, 10), [pv2, art2, pvm2, artm2], H2, W2)
    for g, r in zip(got2, ref2):
        assert jnp.allclose(g, r, atol=1e-5), "banded path mismatch"

    print("KERNEL_OK")
</pallas_src>

<mosaic_0001>
module attributes {stable_mosaic.version = 11 : i64} {
  func.func @kernel(%arg0: i32, %arg1: i32, %arg2: memref<1xi32, #tpu.memory_space<smem>>, %arg3: memref<1x256xi32, #tpu.memory_space<vmem>>, %arg4: memref<24x256xf32, #tpu.memory_space<vmem>>, %arg5: memref<24x256xf32, #tpu.memory_space<vmem>>, %arg6: memref<256x256xbf16, #tpu.memory_space<vmem>>) attributes {dimension_semantics = [#tpu.dimension_semantics<parallel>, #tpu.dimension_semantics<arbitrary>], iteration_bounds = array<i64: 1, 1>, scalar_prefetch = 1 : i64, scratch_operands = 1 : i64, tpu.core_type = #tpu.core_type<tc>, window_params = [{transform_indices = @transform_0, window_bounds = array<i64: 1, 256>}, {transform_indices = @transform_1, window_bounds = array<i64: 24, 256>}, {transform_indices = @transform_2, window_bounds = array<i64: 24, 256>}]} {
    %c0_i32 = arith.constant 0 : i32
    %0 = arith.cmpi eq, %arg1, %c0_i32 : i32
    %1 = arith.extui %0 : i1 to i32
    %c0_i32_0 = arith.constant 0 : i32
    %2 = arith.cmpi ne, %1, %c0_i32_0 : i32
    scf.if %2 {
      %c0_6 = arith.constant 0 : index
      %c0_7 = arith.constant 0 : index
      %8 = vector.load %arg3[%c0_6, %c0_7] : memref<1x256xi32, #tpu.memory_space<vmem>>, vector<1x256xi32>
      %9 = tpu.iota {dimensions = array<i32: 0>} : vector<256x256xi32>
      %10 = vector.broadcast %8 : vector<1x256xi32> to vector<256x256xi32>
      %11 = arith.cmpi eq, %9, %10 : vector<256x256xi32>
      %12 = arith.extui %11 : vector<256x256xi1> to vector<256x256xi32>
      %13 = arith.sitofp %12 : vector<256x256xi32> to vector<256x256xf32>
      %14 = arith.truncf %13 : vector<256x256xf32> to vector<256x256xbf16>
      %c0_8 = arith.constant 0 : index
      %c0_9 = arith.constant 0 : index
      %15 = vector.load %arg6[%c0_8, %c0_9] : memref<256x256xbf16, #tpu.memory_space<vmem>>, vector<256x256xbf16>
      tpu.vector_store %arg6[%c0_8, %c0_9], %14 {strides = array<i32>} : memref<256x256xbf16, #tpu.memory_space<vmem>>, vector<256x256xbf16>,
    } else {
    }
    %c0 = arith.constant 0 : index
    %c0_1 = arith.constant 0 : index
    %3 = vector.load %arg4[%c0, %c0_1] : memref<24x256xf32, #tpu.memory_space<vmem>>, vector<24x256xf32>
    %c0_2 = arith.constant 0 : index
    %c0_3 = arith.constant 0 : index
    %4 = vector.load %arg6[%c0_2, %c0_3] : memref<256x256xbf16, #tpu.memory_space<vmem>>, vector<256x256xbf16>
    %5 = arith.truncf %3 : vector<24x256xf32> to vector<24x256xbf16>
    %cst = arith.constant dense<0.000000e+00> : vector<24x256xf32>
    %6 = tpu.matmul %5, %4, %cst {dimension_numbers = #tpu.dot_dimension_numbers<[1], [0], [0], [1], [0, 0, 1, 1], [], []>} : vector<24x256xbf16>, vector<256x256xbf16>, vector<24x256xf32> -> vector<24x256xf32>
    %c0_4 = arith.constant 0 : index
    %c0_5 = arith.constant 0 : index
    %7 = vector.load %arg5[%c0_4, %c0_5] : memref<24x256xf32, #tpu.memory_space<vmem>>, vector<24x256xf32>
    tpu.vector_store %arg5[%c0_4, %c0_5], %6 {strides = array<i32>} : memref<24x256xf32, #tpu.memory_space<vmem>>, vector<24x256xf32>,
    return
  }
  func.func @transform_0(%arg0: i32, %arg1: i32, %arg2: memref<1xi32, #tpu.memory_space<smem>>) -> (i32, i32) {
    %c0_i32 = arith.constant 0 : i32
    %c0_i32_0 = arith.constant 0 : i32
    return %c0_i32, %arg0 : i32, i32
  }
  func.func @transform_1(%arg0: i32, %arg1: i32, %arg2: memref<1xi32, #tpu.memory_space<smem>>) -> (i32, i32) {
    %c0_i32 = arith.constant 0 : i32
    %c0_i32_0 = arith.constant 0 : i32
    return %arg1, %c0_i32 : i32, i32
  }
  func.func @transform_2(%arg0: i32, %arg1: i32, %arg2: memref<1xi32, #tpu.memory_space<smem>>) -> (i32, i32) {
    %c0_i32 = arith.constant 0 : i32
    return %arg1, %arg0 : i32, i32
  }
}

</mosaic_0001>

<bundles_post_ra>
// kernel: branch_1_fun.1
= control target key start
LH: loop header
LB: loop body
LE: loop exit
PB: predicated region body
PF: predicated region fallthrough
CT: control target
= control target key end

     0   :  { %v19_v0 = vlaneseq  ;;  %s847_s0 = inlined_call_operand.<no memory space> [shape: s32[1], index: 0, kind: input, shape index: {}]   ;;  %s848_s1 = inlined_call_operand.vmem [shape: s32[1,256], index: 1, kind: input, shape index: {}]   ;;  %s849_s2 = inlined_call_operand.vmem [shape: f32[24,256], index: 2, kind: input, shape index: {}]   ;;  %s850_s3 = inlined_call_operand.hbm [shape: f32[24,256], index: 3, kind: output, shape index: {}]  }
   0x1   :  { %v317_v1 = vld [vmem:[%s849_s2 + $0x8] sm:$0xff]  ;;  %v319_v2 = vld [vmem:[%s849_s2 + $0x18] sm:$0xff] }
   0x2   :  { %v355_v3 = vpack.c.bf16 %v319_v2, %v317_v1  ;;  %v321_v4 = vld [vmem:[%s849_s2 + $0x28] sm:$0xff]  ;;  %v652_v5 = vshrl.u32 %v19_v0, 7 }
   0x3   :  { %v357_v6 = vpack.c.bf16 %v321_v4, %v321_v4 }
   0x4   :  { %9 = vsyncpa [#allocation6], 0  ;;  %v18_v7 = vld [vmem:[%s848_s1] sm:$0x3]  ;;  %390 = vmatprep.mubr.bf16.mxu0 %v355_v3  ;;  %v21_v8 = vadd.s32 8, %v652_v5  ;;  %v58_v9 = vsub.s32 1, %v652_v5 }
   0x5   :  { %v54_v10 = vsub.s32 0, %v652_v5  ;;  %400 = vmatprep.mubr.bf16.mxu1 %v357_v6  ;;  %v22_v11 = vadd.s32 16, %v652_v5  ;;  %v23_v12 = vadd.s32 24, %v652_v5  ;;  %v24_v15 = vadd.s32 32, %v652_v5  ;;  %v316_v44 = vld [vmem:[%s849_s2] sm:$0xff]  ;;  %v318_v45 = vld [vmem:[%s849_s2 + $0x10] sm:$0xff] }
   0x6   :  { %v662_v13 = vrot.slane %v18_v7, %v58_v9  ;;  %v25_v16 = vadd.s32 40, %v652_v5  ;;  %v619_v17 = vmov 1.0|1.0   ;;  %v26_v18 = vadd.s32 48, %v652_v5  ;;  %v320_v46 = vld [vmem:[%s849_s2 + $0x20] sm:$0xff]  ;;  %s620_s24 = smov [#allocation5]  }
   0x7   :  { %v664_v14 = vrot.slane %v18_v7, %v54_v10  ;;  %v27_v19 = vadd.s32 56, %v652_v5  ;;  %v28_v20 = vadd.s32 64, %v652_v5  ;;  %v29_v21 = vadd.s32 72, %v652_v5  ;;  %s420_s25 = sshll.u32 %s620_s24, 4  ;;  %s421_s25 = int_to_ptr.vmem [resolvable:$true] %s420_s25 }
   0x8   :  { %vm61_vm0 = vcmp.eq.s32.totalorder %v652_v5, %v662_v13  ;;  %vm63_vm1 = vcmp.eq.s32.totalorder %v21_v8, %v662_v13  ;;  %vm65_vm5 = vcmp.eq.s32.totalorder %v22_v11, %v662_v13  ;;  %vm67_vm6 = vcmp.eq.s32.totalorder %v23_v12, %v662_v13  ;;  %s595_s2 = scalar_lea.vmem %s421_s25, 768  ;;  %p600_p1 = scmp.lt.s32.totalorder %s421_s25, %s421_s25 }
   0x9   :  { %vm60_vm2 = vcmp.eq.s32.totalorder %v652_v5, %v664_v14  ;;  %vm62_vm3 = vcmp.eq.s32.totalorder %v21_v8, %v664_v14  ;;  %vm495_vm4 = vmpackc.low %vm63_vm1, %vm61_vm0  ;;  %vm64_vm7 = vcmp.eq.s32.totalorder %v22_v11, %v664_v14  ;;  %vm66_vm8 = vcmp.eq.s32.totalorder %v23_v12, %v664_v14  ;;  %p596_p0 = scmp.ne.s32.totalorder %s421_s25, %s595_s2  ;;  %p601_p2 = scmp.lt.s32.totalorder %s595_s2, %s595_s2 }
   0xa   :  { %496 = vmatprep.subr.msk.bf16.mxu0 %vm495_vm4, %v619_v17  ;;  %559 = vmatprep.subr.msk.bf16.mxu1 %vm495_vm4, %v619_v17  ;;  %vm497_vm9 = vmpackc.low %vm62_vm3, %vm60_vm2  ;;  %vm69_vm10 = vcmp.eq.s32.totalorder %v24_v15, %v662_v13  ;;  %vm71_vm11 = vcmp.eq.s32.totalorder %v25_v16, %v662_v13  ;;  %vm68_vm15 = vcmp.eq.s32.totalorder %v24_v15, %v664_v14  ;;  %v30_v22 = vadd.s32 80, %v652_v5 }
   0xb   :  { %498 = vmatpush1.bf16.msk.msra.mxu0 %vm497_vm9, %v619_v17  ;;  %575 = vmatpush1.bf16.msk.msra.mxu1 %vm497_vm9, %v619_v17  ;;  %vm499_vm12 = vmpackc.low %vm67_vm6, %vm65_vm5  ;;  %vm70_vm0 = vcmp.eq.s32.totalorder %v25_v16, %v664_v14  ;;  %vm73_vm1 = vcmp.eq.s32.totalorder %v26_v18, %v662_v13  ;;  %vm75_vm2 = vcmp.eq.s32.totalorder %v27_v19, %v662_v13  ;;  %v31_v23 = vadd.s32 88, %v652_v5  ;;  %p602_p3 = por %p601_p2, %p600_p1 }
   0xc   :  { %500 = vmatprep.subr.msk.bf16.mxu0 %vm499_vm12, %v619_v17  ;;  %560 = vmatprep.subr.msk.bf16.mxu1 %vm499_vm12, %v619_v17  ;;  %vm501_vm13 = vmpackc.low %vm66_vm8, %vm64_vm7  ;;  %vm72_vm5 = vcmp.eq.s32.totalorder %v26_v18, %v664_v14  ;;  %vm74_vm6 = vcmp.eq.s32.totalorder %v27_v19, %v664_v14  ;;  %vm77_vm7 = vcmp.eq.s32.totalorder %v28_v20, %v662_v13  ;;  %v32_v24 = vadd.s32 96, %v652_v5 }
   0xd   :  { %vm503_vm14 = vmpackc.low %vm71_vm11, %vm69_vm10  ;;  %vm79_vm8 = vcmp.eq.s32.totalorder %v29_v21, %v662_v13  ;;  %vm76_vm11 = vcmp.eq.s32.totalorder %v28_v20, %v664_v14  ;;  %vm78_vm12 = vcmp.eq.s32.totalorder %v29_v21, %v664_v14  ;;  %v33_v25 = vadd.s32 104, %v652_v5  ;;  %p603_p4 = pnand %p602_p3, %p596_p0 }
   0xe   :  { %vm505_vm3 = vmpackc.low %vm70_vm0, %vm68_vm15  ;;  %v34_v26 = vadd.s32 112, %v652_v5  ;;  %v35_v27 = vadd.s32 120, %v652_v5  ;;  %v36_v28 = vadd.s32 128, %v652_v5  ;;  %v37_v29 = vadd.s32 136, %v652_v5 }
   0xf   :  { %502 = vmatpush1.bf16.msk.msra.mxu0 %vm501_vm13, %v619_v17  ;;  %576 = vmatpush1.bf16.msk.msra.mxu1 %vm501_vm13, %v619_v17  ;;  %vm507_vm4 = vmpackc.low %vm75_vm2, %vm73_vm1  ;;  %vm81_vm13 = vcmp.eq.s32.totalorder %v30_v22, %v662_v13  ;;  %vm80_vm1 = vcmp.eq.s32.totalorder %v30_v22, %v664_v14  ;;  %vm82_vm2 = vcmp.eq.s32.totalorder %v31_v23, %v664_v14  ;;  %v38_v30 = vadd.s32 144, %v652_v5 }
  0x10   :  { %504 = vmatprep.subr.msk.bf16.mxu0 %vm503_vm14, %v619_v17  ;;  %561 = vmatprep.subr.msk.bf16.mxu1 %vm503_vm14, %v619_v17  ;;  %vm509_vm9 = vmpackc.low %vm74_vm6, %vm72_vm5  ;;  %vm83_vm14 = vcmp.eq.s32.totalorder %v31_v23, %v662_v13  ;;  %v39_v31 = vadd.s32 152, %v652_v5  ;;  %v40_v32 = vadd.s32 160, %v652_v5  ;;  %v41_v33 = vadd.s32 168, %v652_v5 }
  0x11   :  { %vm511_vm10 = vmpackc.low %vm79_vm8, %vm77_vm7  ;;  %vm84_vm7 = vcmp.eq.s32.totalorder %v32_v24, %v664_v14  ;;  %vm86_vm8 = vcmp.eq.s32.totalorder %v33_v25, %v664_v14  ;;  %v42_v34 = vadd.s32 176, %v652_v5  ;;  %v43_v35 = vadd.s32 184, %v652_v5 }
  0x12   :  { %vm513_vm15 = vmpackc.low %vm78_vm12, %vm76_vm11  ;;  %v44_v36 = vadd.s32 192, %v652_v5  ;;  %v45_v37 = vadd.s32 200, %v652_v5  ;;  %v46_v38 = vadd.s32 208, %v652_v5  ;;  %v47_v39 = vadd.s32 216, %v652_v5 }
  0x13   :  { %506 = vmatpush1.bf16.msk.msra.mxu0 %vm505_vm3, %v619_v17  ;;  %577 = vmatpush1.bf16.msk.msra.mxu1 %vm505_vm3, %v619_v17  ;;  %vm515_vm0 = vmpackc.low %vm83_vm14, %vm81_vm13  ;;  %vm85_vm3 = vcmp.eq.s32.totalorder %v32_v24, %v662_v13  ;;  %vm88_vm13 = vcmp.eq.s32.totalorder %v34_v26, %v664_v14  ;;  %vm90_vm14 = vcmp.eq.s32.totalorder %v35_v27, %v664_v14  ;;  %v48_v40 = vadd.s32 224, %v652_v5 }
  0x14   :  { %508 = vmatprep.subr.msk.bf16.mxu0 %vm507_vm4, %v619_v17  ;;  %562 = vmatprep.subr.msk.bf16.mxu1 %vm507_vm4, %v619_v17  ;;  %vm87_vm4 = vcmp.eq.s32.totalorder %v33_v25, %v662_v13  ;;  %vm517_vm5 = vmpackc.low %vm82_vm2, %vm80_vm1  ;;  %v49_v41 = vadd.s32 232, %v652_v5  ;;  %v50_v42 = vadd.s32 240, %v652_v5  ;;  %v51_v43 = vadd.s32 248, %v652_v5 }
  0x15   :  { %vm519_vm6 = vmpackc.low %vm87_vm4, %vm85_vm3  ;;  %vm92_vm3 = vcmp.eq.s32.totalorder %v36_v28, %v664_v14  ;;  %vm94_vm4 = vcmp.eq.s32.totalorder %v37_v29, %v664_v14  ;;  %v354_v47 = vpack.c.bf16 %v318_v45, %v316_v44  ;;  %v356_v48 = vpack.c.bf16 %v320_v46, %v320_v46 }
  0x16   :  { %vm521_vm11 = vmpackc.low %vm86_vm8, %vm84_vm7 }
  0x17   :  { %510 = vmatpush1.bf16.msk.msra.mxu0 %vm509_vm9, %v619_v17  ;;  %578 = vmatpush1.bf16.msk.msra.mxu1 %vm509_vm9, %v619_v17  ;;  %vm89_vm9 = vcmp.eq.s32.totalorder %v34_v26, %v662_v13  ;;  %vm525_vm1 = vmpackc.low %vm90_vm14, %vm88_vm13 }
  0x18   :  { %512 = vmatprep.subr.msk.bf16.mxu0 %vm511_vm10, %v619_v17  ;;  %563 = vmatprep.subr.msk.bf16.mxu1 %vm511_vm10, %v619_v17  ;;  %vm91_vm10 = vcmp.eq.s32.totalorder %v35_v27, %v662_v13  ;;  %vm529_vm7 = vmpackc.low %vm94_vm4, %vm92_vm3 }
  0x19   :  { %vm523_vm12 = vmpackc.low %vm91_vm10, %vm89_vm9  ;;  %vm96_vm9 = vcmp.eq.s32.totalorder %v38_v30, %v664_v14  ;;  %vm98_vm10 = vcmp.eq.s32.totalorder %v39_v31, %v664_v14 }
  0x1a   :  { %vm533_vm13 = vmpackc.low %vm98_vm10, %vm96_vm9 }
  0x1b   :  { %514 = vmatpush1.bf16.msk.msra.mxu0 %vm513_vm15, %v619_v17  ;;  %579 = vmatpush1.bf16.msk.msra.mxu1 %vm513_vm15, %v619_v17  ;;  %vm93_vm15 = vcmp.eq.s32.totalorder %v36_v28, %v662_v13 }
  0x1c   :  { %516 = vmatprep.subr.msk.bf16.mxu0 %vm515_vm0, %v619_v17  ;;  %564 = vmatprep.subr.msk.bf16.mxu1 %vm515_vm0, %v619_v17  ;;  %vm95_vm0 = vcmp.eq.s32.totalorder %v37_v29, %v662_v13 }
  0x1d   :  { %vm527_vm2 = vmpackc.low %vm95_vm0, %vm93_vm15  ;;  %vm100_vm15 = vcmp.eq.s32.totalorder %v40_v32, %v664_v14  ;;  %vm102_vm0 = vcmp.eq.s32.totalorder %v41_v33, %v664_v14 }
  0x1e   :  { %vm537_vm3 = vmpackc.low %vm102_vm0, %vm100_vm15 }
  0x1f   :  { %518 = vmatpush1.bf16.msk.msra.mxu0 %vm517_vm5, %v619_v17  ;;  %580 = vmatpush1.bf16.msk.msra.mxu1 %vm517_vm5, %v619_v17  ;;  %vm97_vm5 = vcmp.eq.s32.totalorder %v38_v30, %v662_v13 }
  0x20   :  { %520 = vmatprep.subr.msk.bf16.mxu0 %vm519_vm6, %v619_v17  ;;  %565 = vmatprep.subr.msk.bf16.mxu1 %vm519_vm6, %v619_v17  ;;  %vm99_vm6 = vcmp.eq.s32.totalorder %v39_v31, %v662_v13 }
  0x21   :  { %vm531_vm8 = vmpackc.low %vm99_vm6, %vm97_vm5  ;;  %vm104_vm5 = vcmp.eq.s32.totalorder %v42_v34, %v664_v14  ;;  %vm106_vm6 = vcmp.eq.s32.totalorder %v43_v35, %v664_v14 }
  0x22   :  { %vm541_vm9 = vmpackc.low %vm106_vm6, %vm104_vm5 }
  0x23   :  { %522 = vmatpush1.bf16.msk.msra.mxu0 %vm521_vm11, %v619_v17  ;;  %581 = vmatpush1.bf16.msk.msra.mxu1 %vm521_vm11, %v619_v17  ;;  %vm101_vm11 = vcmp.eq.s32.totalorder %v40_v32, %v662_v13 }
  0x24   :  { %524 = vmatprep.subr.msk.bf16.mxu0 %vm523_vm12, %v619_v17  ;;  %566 = vmatprep.subr.msk.bf16.mxu1 %vm523_vm12, %v619_v17  ;;  %vm103_vm12 = vcmp.eq.s32.totalorder %v41_v33, %v662_v13 }
  0x25   :  { %vm535_vm14 = vmpackc.low %vm103_vm12, %vm101_vm11  ;;  %vm108_vm11 = vcmp.eq.s32.totalorder %v44_v36, %v664_v14  ;;  %vm110_vm12 = vcmp.eq.s32.totalorder %v45_v37, %v664_v14 }
  0x26   :  { %vm545_vm15 = vmpackc.low %vm110_vm12, %vm108_vm11 }
  0x27   :  { %526 = vmatpush1.bf16.msk.msra.mxu0 %vm525_vm1, %v619_v17  ;;  %582 = vmatpush1.bf16.msk.msra.mxu1 %vm525_vm1, %v619_v17  ;;  %vm105_vm1 = vcmp.eq.s32.totalorder %v42_v34, %v662_v13 }
  0x28   :  { %528 = vmatprep.subr.msk.bf16.mxu0 %vm527_vm2, %v619_v17  ;;  %567 = vmatprep.subr.msk.bf16.mxu1 %vm527_vm2, %v619_v17  ;;  %vm107_vm2 = vcmp.eq.s32.totalorder %v43_v35, %v662_v13 }
  0x29   :  { %vm539_vm4 = vmpackc.low %vm107_vm2, %vm105_vm1  ;;  %vm112_vm1 = vcmp.eq.s32.totalorder %v46_v38, %v664_v14  ;;  %vm114_vm2 = vcmp.eq.s32.totalorder %v47_v39, %v664_v14 }
  0x2a   :  { %vm549_vm5 = vmpackc.low %vm114_vm2, %vm112_vm1 }
  0x2b   :  { %530 = vmatpush1.bf16.msk.msra.mxu0 %vm529_vm7, %v619_v17  ;;  %583 = vmatpush1.bf16.msk.msra.mxu1 %vm529_vm7, %v619_v17  ;;  %vm109_vm7 = vcmp.eq.s32.totalorder %v44_v36, %v662_v13 }
  0x2c   :  { %532 = vmatprep.subr.msk.bf16.mxu0 %vm531_vm8, %v619_v17  ;;  %568 = vmatprep.subr.msk.bf16.mxu1 %vm531_vm8, %v619_v17  ;;  %vm111_vm8 = vcmp.eq.s32.totalorder %v45_v37, %v662_v13 }
  0x2d   :  { %vm543_vm10 = vmpackc.low %vm111_vm8, %vm109_vm7  ;;  %vm116_vm7 = vcmp.eq.s32.totalorder %v48_v40, %v664_v14  ;;  %vm118_vm8 = vcmp.eq.s32.totalorder %v49_v41, %v664_v14 }
  0x2e   :  { %vm553_vm11 = vmpackc.low %vm118_vm8, %vm116_vm7 }
  0x2f   :  { %534 = vmatpush1.bf16.msk.msra.mxu0 %vm533_vm13, %v619_v17  ;;  %584 = vmatpush1.bf16.msk.msra.mxu1 %vm533_vm13, %v619_v17  ;;  %vm113_vm13 = vcmp.eq.s32.totalorder %v46_v38, %v662_v13 }
  0x30   :  { %536 = vmatprep.subr.msk.bf16.mxu0 %vm535_vm14, %v619_v17  ;;  %569 = vmatprep.subr.msk.bf16.mxu1 %vm535_vm14, %v619_v17  ;;  %vm115_vm14 = vcmp.eq.s32.totalorder %v47_v39, %v662_v13 }
  0x31   :  { %vm547_vm0 = vmpackc.low %vm115_vm14, %vm113_vm13  ;;  %vm120_vm13 = vcmp.eq.s32.totalorder %v50_v42, %v664_v14  ;;  %vm122_vm14 = vcmp.eq.s32.totalorder %v51_v43, %v664_v14 }
  0x33   :  { %538 = vmatpush1.bf16.msk.msra.mxu0 %vm537_vm3, %v619_v17  ;;  %585 = vmatpush1.bf16.msk.msra.mxu1 %vm537_vm3, %v619_v17  ;;  %vm117_vm3 = vcmp.eq.s32.totalorder %v48_v40, %v662_v13 }
  0x34   :  { %540 = vmatprep.subr.msk.bf16.mxu0 %vm539_vm4, %v619_v17  ;;  %570 = vmatprep.subr.msk.bf16.mxu1 %vm539_vm4, %v619_v17  ;;  %vm119_vm4 = vcmp.eq.s32.totalorder %v49_v41, %v662_v13 }
  0x35   :  { %vm551_vm6 = vmpackc.low %vm119_vm4, %vm117_vm3 }
  0x37   :  { %542 = vmatpush1.bf16.msk.msra.mxu0 %vm541_vm9, %v619_v17  ;;  %586 = vmatpush1.bf16.msk.msra.mxu1 %vm541_vm9, %v619_v17  ;;  %vm121_vm9 = vcmp.eq.s32.totalorder %v50_v42, %v662_v13 }
  0x38   :  { %544 = vmatprep.subr.msk.bf16.mxu0 %vm543_vm10, %v619_v17  ;;  %571 = vmatprep.subr.msk.bf16.mxu1 %vm543_vm10, %v619_v17  ;;  %vm123_vm10 = vcmp.eq.s32.totalorder %v51_v43, %v662_v13 }
  0x39   :  { %vm555_vm12 = vmpackc.low %vm123_vm10, %vm121_vm9 }
  0x3b   :  { %546 = vmatpush1.bf16.msk.msra.mxu0 %vm545_vm15, %v619_v17  ;;  %587 = vmatpush1.bf16.msk.msra.mxu1 %vm545_vm15, %v619_v17  ;;  %vm557_vm15 = vmpackc.low %vm122_vm14, %vm120_vm13 }
  0x3c   :  { %548 = vmatprep.subr.msk.bf16.mxu0 %vm547_vm0, %v619_v17  ;;  %572 = vmatprep.subr.msk.bf16.mxu1 %vm547_vm0, %v619_v17 }
  0x3f   :  { %550 = vmatpush1.bf16.msk.msra.mxu0 %vm549_vm5, %v619_v17  ;;  %588 = vmatpush1.bf16.msk.msra.mxu1 %vm549_vm5, %v619_v17 }
  0x40   :  { %552 = vmatprep.subr.msk.bf16.mxu0 %vm551_vm6, %v619_v17  ;;  %573 = vmatprep.subr.msk.bf16.mxu1 %vm551_vm6, %v619_v17 }
  0x43   :  { %554 = vmatpush1.bf16.msk.msra.mxu0 %vm553_vm11, %v619_v17  ;;  %589 = vmatpush1.bf16.msk.msra.mxu1 %vm553_vm11, %v619_v17 }
  0x44   :  { %556 = vmatprep.subr.msk.bf16.mxu0 %vm555_vm12, %v619_v17  ;;  %574 = vmatprep.subr.msk.bf16.mxu1 %vm555_vm12, %v619_v17 }
  0x47   :  { %558 = vmatpush1.bf16.msk.msra.mxu0 %vm557_vm15, %v619_v17  ;;  %590 = vmatpush1.bf16.msk.msra.mxu1 %vm557_vm15, %v619_v17 }
  0x4a   :  { %391 = vmatmul.mubr.bf16.vlgmr.msra.gmra.mrb[0].mxu0 %v354_v47  ;;  %401 = vmatmul.mubr.bf16.vlgmr.msra.gmra.mrb[0].mxu1 %v356_v48 }
 0x11d   :  { %v392_v49 = vpop.f32.mrb[0].mxu0  ;;  %v402_v50 = vpop.f32.mrb[0].mxu1 }
 0x11e   :  { %409 = vst [vmem:[#allocation5] sm:$0xff] %v392_v49  ;;  %413 = vst [vmem:[#allocation5 + $0x20] sm:$0xff] %v402_v50  ;;  %v394_v51 = vpop.f32.mrb[1].mxu0  ;;  %v404_v52 = vpop.f32.mrb[1].mxu1 }
 0x11f   :  { %410 = vst [vmem:[#allocation5 + $0x8] sm:$0xff] %v394_v51  ;;  %414 = vst [vmem:[#allocation5 + $0x28] sm:$0xff] %v404_v52  ;;  %v396_v53 = vpop.f32.mrb[2].mxu0  ;;  %v406_v54 = vpop.f32.mrb[2].mxu1 }
 0x120   :  { %411 = vst [vmem:[#allocation5 + $0x10] sm:$0xff] %v396_v53  ;;  %v398_v55 = vpop.f32.mrb[3].mxu0  ;;  %v407_v56 = vpop.f32.mrb[3].mxu1 }
 0x121   :  { %412 = vst [vmem:[#allocation5 + $0x18] sm:$0xff] %v398_v55 }
 0x122   :  { %606 = shalt.err (!%p603_p4)
}
 0x123   :  { %s607_s28 = scalar_lea.hbm %s850_s3, 768 }
 0x124   :  { %p608_p5 = scmp.ne.s32.totalorder %s850_s3, %s607_s28  ;;  %p611_p6 = scmp.lt.u32.totalorder %s607_s28, %s850_s3 }
 0x126   :  { %p613_p7 = pnand %p611_p6, %p608_p5 }
 0x128   :  { %616 = shalt.err (!%p613_p7)
}
 0x129   :  { %s621_s6 = smov 256   ;;  %s622_s7 = smov 16  }
 0x12a   :  { %426 = dma.vmem_to_hbm [thread:$0]  %s421_s25, 768, %s850_s3, [#allocation6], %s621_s6, %s621_s6, %s622_s7  }
 0x12b   :  { %617 = dma.done.wait [#allocation6], 768  }
 0x12c   :  { %618 = vsyncadd [#allocation6], 4294966528 }
 0x12d   :  { %430 = vsyncpa [#allocation6], 1 }

</bundles_post_ra>
